<compile_context>
chip_gen: v5e
topology: v5e:2x2
jax: 0.10.0
libtpu: 0.0.40
codegen_flags: <defaults>
</compile_context>

<pallas_src>
import jax
import jax.numpy as jnp
from jax.experimental import pallas as pl
from jax.experimental.pallas import tpu as pltpu


def _round_up(n: int, m: int) -> int:
    return ((n + m - 1) // m) * m


def _head_kernel(x_ref, w1_ref, b1_ref, w2_ref, b2_ref, logits_ref, probs_ref):
    # x_ref: [TM, Dp] (bf16 or f32), w1_ref: [Dp, Hp], b1_ref: [1, Hp],
    # w2_ref: [Hp, Cp] f32, b2_ref: [1, Cp] f32 (padded classes hold -1e30).
    h = jnp.dot(x_ref[...], w1_ref[...], preferred_element_type=jnp.float32)
    h = jnp.maximum(h + b1_ref[...], 0.0)                      # ReLU, f32
    # TODO(synk): training-mode dropout (p=0.1) not implemented (identity at inference).
    logits = jnp.dot(h, w2_ref[...], preferred_element_type=jnp.float32) + b2_ref[...]
    logits_ref[...] = logits                                   # 'model.logits.head_0'
    # softmax over the class axis; padded class lanes carry -1e30 -> exp underflows to 0.
    m = jnp.max(logits, axis=1, keepdims=True)
    e = jnp.exp(logits - m)
    denom = jnp.sum(e, axis=1, keepdims=True)
    probs_ref[...] = e * pl.reciprocal(denom, approx=False)    # 'model.output.head_0'


def fuse_head_1d_classifier(x, w1, b1, w2, b2, *, block_m: int = 256, use_bf16: bool = True):
    """x: [B, D] f32; w1: [D, H]; b1: [1, H]; w2: [H, C]; b2: [1, C] -> (logits, probs) [B, C]."""
    B, D = x.shape
    H = w1.shape[1]
    C = w2.shape[1]

    # Lane/sublane-friendly padded sizes.
    D_pad = _round_up(D, 128)
    H_pad = _round_up(H, 128)
    C_pad = _round_up(C, 128)

    B_pad = _round_up(B, 8)
    tm = min(block_m, B_pad)        # tm is always a multiple of 8
    B_pad = _round_up(B_pad, tm)

    # Zero-pad data/weights (exact); pad class biases with -1e30 so softmax ignores them.
    x_p = jnp.pad(x, ((0, B_pad - B), (0, D_pad - D)))
    w1_p = jnp.pad(w1, ((0, D_pad - D), (0, H_pad - H)))
    b1_p = jnp.pad(b1, ((0, 0), (0, H_pad - H)))
    w2_p = jnp.pad(w2, ((0, H_pad - H), (0, C_pad - C)))
    b2_p = jnp.pad(b2, ((0, 0), (0, C_pad - C)), constant_values=-1e30)

    if use_bf16:
        # bf16 operands for the big matmul (MXU rate + halved DMA); accumulate stays f32.
        x_p = x_p.astype(jnp.bfloat16)
        w1_p = w1_p.astype(jnp.bfloat16)

    grid = (B_pad // tm,)

    logits_p, probs_p = pl.pallas_call(
        _head_kernel,
        out_shape=(
            jax.ShapeDtypeStruct((B_pad, C_pad), jnp.float32),
            jax.ShapeDtypeStruct((B_pad, C_pad), jnp.float32),
        ),
        grid_spec=pltpu.PrefetchScalarGridSpec(
            num_scalar_prefetch=0,
            grid=grid,
            in_specs=[
                pl.BlockSpec((tm, D_pad), lambda i: (i, 0)),      # x: tiled over batch
                pl.BlockSpec((D_pad, H_pad), lambda i: (0, 0)),   # w1: resident
                pl.BlockSpec((1, H_pad), lambda i: (0, 0)),       # b1: resident
                pl.BlockSpec((H_pad, C_pad), lambda i: (0, 0)),   # w2: resident
                pl.BlockSpec((1, C_pad), lambda i: (0, 0)),       # b2: resident
            ],
            out_specs=(
                pl.BlockSpec((tm, C_pad), lambda i: (i, 0)),      # logits (lane-dense slab)
                pl.BlockSpec((tm, C_pad), lambda i: (i, 0)),      # probs  (lane-dense slab)
            ),
        ),
        compiler_params=pltpu.CompilerParams(
            dimension_semantics=("parallel",),   # batch axis -> both TCs on v7x
        ),
    )(x_p, w1_p, b1_p, w2_p, b2_p)

    return logits_p[:B, :C], probs_p[:B, :C]


def _reference(x, w1, b1, w2, b2, *, use_bf16: bool = True):
    """Pure-JAX reference with the same precision choices as the kernel."""
    if use_bf16:
        xm = x.astype(jnp.bfloat16)
        w1m = w1.astype(jnp.bfloat16)
    else:
        xm, w1m = x, w1
    h = jnp.maximum(jnp.dot(xm, w1m, preferred_element_type=jnp.float32) + b1, 0.0)
    logits = jnp.dot(h, w2, preferred_element_type=jnp.float32) + b2
    return logits, jax.nn.softmax(logits, axis=1)


if __name__ == "__main__":
    # Module defaults: conv_inputs=(('model.backbone_features', 193),),
    # layers_description=(256,), num_classes=2.
    B, D, H, C = 4, 193, 256, 2

    key = jax.random.PRNGKey(0)
    kx, kw1, kb1, kw2, kb2 = jax.random.split(key, 5)

    x = jax.random.normal(kx, (B, D), dtype=jnp.float32)
    # Deterministic synthetic parameters (shapes match nn.Linear(193,256) / nn.Linear(256,2)).
    w1 = jax.random.normal(kw1, (D, H), dtype=jnp.float32) * 0.05
    b1 = jax.random.normal(kb1, (1, H), dtype=jnp.float32) * 0.05
    w2 = jax.random.normal(kw2, (H, C), dtype=jnp.float32) * 0.05
    b2 = jax.random.normal(kb2, (1, C), dtype=jnp.float32) * 0.05

    logits, probs = jax.jit(fuse_head_1d_classifier)(x, w1, b1, w2, b2)
    jax.block_until_ready((logits, probs))

    ref_logits, ref_probs = _reference(x, w1, b1, w2, b2)
    assert logits.shape == (B, C) and probs.shape == (B, C)
    assert jnp.allclose(logits, ref_logits, atol=1e-4, rtol=1e-4)
    assert jnp.allclose(probs, ref_probs, atol=1e-5, rtol=1e-4)
    assert jnp.allclose(jnp.sum(probs, axis=1), 1.0, atol=1e-5)

    print("KERNEL_OK")
</pallas_src>

<mosaic_0001>
module attributes {stable_mosaic.version = 11 : i64} {
  func.func @_head_kernel(%arg0: i32, %arg1: memref<8x256xbf16, #tpu.memory_space<vmem>>, %arg2: memref<256x256xbf16, #tpu.memory_space<vmem>>, %arg3: memref<1x256xf32, #tpu.memory_space<vmem>>, %arg4: memref<256x128xf32, #tpu.memory_space<vmem>>, %arg5: memref<1x128xf32, #tpu.memory_space<vmem>>, %arg6: memref<8x128xf32, #tpu.memory_space<vmem>>, %arg7: memref<8x128xf32, #tpu.memory_space<vmem>>) attributes {dimension_semantics = [#tpu.dimension_semantics<parallel>], iteration_bounds = array<i64: 1>, scalar_prefetch = 0 : i64, scratch_operands = 0 : i64, tpu.core_type = #tpu.core_type<tc>, window_params = [{transform_indices = @transform_0, window_bounds = array<i64: 8, 256>}, {pipeline_mode = #tpu.pipeline_mode<synchronous>, transform_indices = @transform_1, window_bounds = array<i64: 256, 256>}, {pipeline_mode = #tpu.pipeline_mode<synchronous>, transform_indices = @transform_2, window_bounds = array<i64: 1, 256>}, {pipeline_mode = #tpu.pipeline_mode<synchronous>, transform_indices = @transform_3, window_bounds = array<i64: 256, 128>}, {pipeline_mode = #tpu.pipeline_mode<synchronous>, transform_indices = @transform_4, window_bounds = array<i64: 1, 128>}, {transform_indices = @transform_5, window_bounds = array<i64: 8, 128>}, {transform_indices = @transform_6, window_bounds = array<i64: 8, 128>}]} {
    %c0 = arith.constant 0 : index
    %c0_0 = arith.constant 0 : index
    %0 = vector.load %arg1[%c0, %c0_0] : memref<8x256xbf16, #tpu.memory_space<vmem>>, vector<8x256xbf16>
    %c0_1 = arith.constant 0 : index
    %c0_2 = arith.constant 0 : index
    %1 = vector.load %arg2[%c0_1, %c0_2] : memref<256x256xbf16, #tpu.memory_space<vmem>>, vector<256x256xbf16>
    %cst = arith.constant dense<0.000000e+00> : vector<8x256xf32>
    %2 = tpu.matmul %0, %1, %cst {dimension_numbers = #tpu.dot_dimension_numbers<[1], [0], [0], [1], [0, 0, 1, 1], [], []>} : vector<8x256xbf16>, vector<256x256xbf16>, vector<8x256xf32> -> vector<8x256xf32>
    %c0_3 = arith.constant 0 : index
    %c0_4 = arith.constant 0 : index
    %3 = vector.load %arg3[%c0_3, %c0_4] : memref<1x256xf32, #tpu.memory_space<vmem>>, vector<1x256xf32>
    %4 = vector.broadcast %3 : vector<1x256xf32> to vector<8x256xf32>
    %5 = arith.addf %2, %4 : vector<8x256xf32>
    %cst_5 = arith.constant 0.000000e+00 : f32
    %6 = vector.broadcast %cst_5 : f32 to vector<8x256xf32>
    %7 = arith.maximumf %5, %6 : vector<8x256xf32>
    %c0_6 = arith.constant 0 : index
    %c0_7 = arith.constant 0 : index
    %8 = vector.load %arg4[%c0_6, %c0_7] : memref<256x128xf32, #tpu.memory_space<vmem>>, vector<256x128xf32>
    %cst_8 = arith.constant dense<0.000000e+00> : vector<8x128xf32>
    %9 = tpu.matmul %7, %8, %cst_8 {dimension_numbers = #tpu.dot_dimension_numbers<[1], [0], [0], [1], [0, 0, 1, 1], [], []>} : vector<8x256xf32>, vector<256x128xf32>, vector<8x128xf32> -> vector<8x128xf32>
    %c0_9 = arith.constant 0 : index
    %c0_10 = arith.constant 0 : index
    %10 = vector.load %arg5[%c0_9, %c0_10] : memref<1x128xf32, #tpu.memory_space<vmem>>, vector<1x128xf32>
    %11 = vector.broadcast %10 : vector<1x128xf32> to vector<8x128xf32>
    %12 = arith.addf %9, %11 : vector<8x128xf32>
    %c0_11 = arith.constant 0 : index
    %c0_12 = arith.constant 0 : index
    %13 = vector.load %arg6[%c0_11, %c0_12] : memref<8x128xf32, #tpu.memory_space<vmem>>, vector<8x128xf32>
    tpu.vector_store %arg6[%c0_11, %c0_12], %12 {strides = array<i32>} : memref<8x128xf32, #tpu.memory_space<vmem>>, vector<8x128xf32>,
    %cst_13 = arith.constant dense<0xFF800000> : vector<8xf32>
    %14 = vector.multi_reduction <maximumf>, %12, %cst_13 [1] : vector<8x128xf32> to vector<8xf32>
    %15 = vector.shape_cast %14 : vector<8xf32> to vector<8x1xf32>
    %16 = vector.broadcast %15 : vector<8x1xf32> to vector<8x128xf32>
    %17 = arith.subf %12, %16 : vector<8x128xf32>
    %18 = math.exp %17 : vector<8x128xf32>
    %cst_14 = arith.constant dense<0.000000e+00> : vector<8xf32>
    %19 = vector.multi_reduction <add>, %18, %cst_14 [1] : vector<8x128xf32> to vector<8xf32>
    %20 = vector.shape_cast %19 : vector<8xf32> to vector<8x1xf32>
    %21 = tpu.reciprocal %20 : vector<8x1xf32> -> vector<8x1xf32>
    %22 = vector.broadcast %21 : vector<8x1xf32> to vector<8x128xf32>
    %23 = arith.mulf %18, %22 : vector<8x128xf32>
    %c0_15 = arith.constant 0 : index
    %c0_16 = arith.constant 0 : index
    %24 = vector.load %arg7[%c0_15, %c0_16] : memref<8x128xf32, #tpu.memory_space<vmem>>, vector<8x128xf32>
    tpu.vector_store %arg7[%c0_15, %c0_16], %23 {strides = array<i32>} : memref<8x128xf32, #tpu.memory_space<vmem>>, vector<8x128xf32>,
    return
  }
  func.func @transform_0(%arg0: i32) -> (i32, i32) {
    %c0_i32 = arith.constant 0 : i32
    %c0_i32_0 = arith.constant 0 : i32
    return %arg0, %c0_i32 : i32, i32
  }
  func.func @transform_1(%arg0: i32) -> (i32, i32) {
    %c0_i32 = arith.constant 0 : i32
    %c0_i32_0 = arith.constant 0 : i32
    %c0_i32_1 = arith.constant 0 : i32
    return %c0_i32, %c0_i32_0 : i32, i32
  }
  func.func @transform_2(%arg0: i32) -> (i32, i32) {
    %c0_i32 = arith.constant 0 : i32
    %c0_i32_0 = arith.constant 0 : i32
    %c0_i32_1 = arith.constant 0 : i32
    return %c0_i32, %c0_i32_0 : i32, i32
  }
  func.func @transform_3(%arg0: i32) -> (i32, i32) {
    %c0_i32 = arith.constant 0 : i32
    %c0_i32_0 = arith.constant 0 : i32
    %c0_i32_1 = arith.constant 0 : i32
    return %c0_i32, %c0_i32_0 : i32, i32
  }
  func.func @transform_4(%arg0: i32) -> (i32, i32) {
    %c0_i32 = arith.constant 0 : i32
    %c0_i32_0 = arith.constant 0 : i32
    %c0_i32_1 = arith.constant 0 : i32
    return %c0_i32, %c0_i32_0 : i32, i32
  }
  func.func @transform_5(%arg0: i32) -> (i32, i32) {
    %c0_i32 = arith.constant 0 : i32
    %c0_i32_0 = arith.constant 0 : i32
    return %arg0, %c0_i32 : i32, i32
  }
  func.func @transform_6(%arg0: i32) -> (i32, i32) {
    %c0_i32 = arith.constant 0 : i32
    %c0_i32_0 = arith.constant 0 : i32
    return %arg0, %c0_i32 : i32, i32
  }
}

</mosaic_0001>

<bundles_post_ra>
// kernel: fuse_head_1d_classifier.1
= control target key start
LH: loop header
LB: loop body
LE: loop exit
PB: predicated region body
PF: predicated region fallthrough
CT: control target
= control target key end

     0   :  { %s893_s1 = inlined_call_operand.vmem [shape: bf16[256,256], index: 1, kind: input, shape index: {}]   ;;  %s894_s0 = inlined_call_operand.vmem [shape: bf16[8,256], index: 0, kind: input, shape index: {}]   ;;  %s895_s3 = inlined_call_operand.vmem [shape: f32[256,128], index: 3, kind: input, shape index: {}]   ;;  %s896_s4 = inlined_call_operand.vmem [shape: f32[1,128], index: 4, kind: input, shape index: {}]   ;;  %s897_s2 = inlined_call_operand.vmem [shape: f32[1,256], index: 2, kind: input, shape index: {}]   ;;  %s898_s5 = inlined_call_operand.vmem [shape: f32[8,128], index: 5, kind: output, shape index: {0}]   ;;  %s899_s6 = inlined_call_operand.vmem [shape: f32[8,128], index: 6, kind: output, shape index: {1}]  }
   0x1   :  { %v448_v0 = vld [vmem:[%s893_s1 + $0x70] sm:$0xf]  ;;  %v533_v1 = vld [vmem:[%s893_s1 + $0x74] sm:$0xf0]  ;;  %v532_v5 = vld [vmem:[%s893_s1 + $0x74] sm:$0xf] }
   0x2   :  { %v512_v2 = vld [vmem:[%s893_s1 + $0xf0] sm:$0xf]  ;;  %v449_v3 = vor.u32 %v533_v1, %v448_v0  ;;  %v549_v4 = vld [vmem:[%s893_s1 + $0xf4] sm:$0xf0]  ;;  %v450_v6 = vld [vmem:[%s893_s1 + $0x78] sm:$0xf0] }
   0x3   :  { %v513_v7 = vor.u32 %v549_v4, %v512_v2  ;;  %v453_v8 = vor.u32 %v532_v5, %v450_v6  ;;  %v548_v9 = vld [vmem:[%s893_s1 + $0xf4] sm:$0xf]  ;;  %v514_v10 = vld [vmem:[%s893_s1 + $0xf8] sm:$0xf0]  ;;  %v440_v11 = vld [vmem:[%s893_s1 + $0x60] sm:$0xf] }
   0x4   :  { %228 = vmatpush.bf16.msra.mxu0 %v449_v3  ;;  %v517_v12 = vor.u32 %v548_v9, %v514_v10  ;;  %v531_v13 = vld [vmem:[%s893_s1 + $0x64] sm:$0xf0]  ;;  %v504_v14 = vld [vmem:[%s893_s1 + $0xe0] sm:$0xf]  ;;  %v530_v18 = vld [vmem:[%s893_s1 + $0x64] sm:$0xf] }
   0x5   :  { %v547_v15 = vld [vmem:[%s893_s1 + $0xe4] sm:$0xf0]  ;;  %241 = vmatpush.bf16.msra.mxu1 %v513_v7  ;;  %254 = vmatpush.bf16.msra.mxu2 %v453_v8  ;;  %v441_v16 = vor.u32 %v531_v13, %v440_v11  ;;  %v442_v19 = vld [vmem:[%s893_s1 + $0x68] sm:$0xf0]  ;;  %v546_v20 = vld [vmem:[%s893_s1 + $0xe4] sm:$0xf] }
   0x6   :  { %v505_v17 = vor.u32 %v547_v15, %v504_v14  ;;  %267 = vmatpush.bf16.msra.mxu3 %v517_v12  ;;  %v445_v21 = vor.u32 %v530_v18, %v442_v19  ;;  %v506_v22 = vld [vmem:[%s893_s1 + $0xe8] sm:$0xf0]  ;;  %v432_v23 = vld [vmem:[%s893_s1 + $0x50] sm:$0xf]  ;;  %v529_v24 = vld [vmem:[%s893_s1 + $0x54] sm:$0xf0] }
   0x7   :  { %v509_v25 = vor.u32 %v546_v20, %v506_v22  ;;  %v496_v26 = vld [vmem:[%s893_s1 + $0xd0] sm:$0xf]  ;;  %v545_v27 = vld [vmem:[%s893_s1 + $0xd4] sm:$0xf0]  ;;  %v528_v28 = vld [vmem:[%s893_s1 + $0x54] sm:$0xf]  ;;  %v433_v29 = vor.u32 %v529_v24, %v432_v23 }
   0x8   :  { %229 = vmatpush.bf16.msra.mxu0 %v441_v16  ;;  %v434_v30 = vld [vmem:[%s893_s1 + $0x58] sm:$0xf0]  ;;  %v544_v31 = vld [vmem:[%s893_s1 + $0xd4] sm:$0xf]  ;;  %v497_v33 = vor.u32 %v545_v27, %v496_v26  ;;  %v424_v35 = vld [vmem:[%s893_s1 + $0x40] sm:$0xf] }
   0x9   :  { %v498_v32 = vld [vmem:[%s893_s1 + $0xd8] sm:$0xf0]  ;;  %242 = vmatpush.bf16.msra.mxu1 %v505_v17  ;;  %255 = vmatpush.bf16.msra.mxu2 %v445_v21  ;;  %v437_v34 = vor.u32 %v528_v28, %v434_v30  ;;  %v527_v36 = vld [vmem:[%s893_s1 + $0x44] sm:$0xf0]  ;;  %v488_v37 = vld [vmem:[%s893_s1 + $0xc0] sm:$0xf] }
   0xa   :  { %268 = vmatpush.bf16.msra.mxu3 %v509_v25  ;;  %v501_v38 = vor.u32 %v544_v31, %v498_v32  ;;  %v543_v39 = vld [vmem:[%s893_s1 + $0xc4] sm:$0xf0]  ;;  %v526_v40 = vld [vmem:[%s893_s1 + $0x44] sm:$0xf]  ;;  %v426_v41 = vld [vmem:[%s893_s1 + $0x48] sm:$0xf0]  ;;  %v425_v44 = vor.u32 %v527_v36, %v424_v35 }
   0xb   :  { %v542_v42 = vld [vmem:[%s893_s1 + $0xc4] sm:$0xf]  ;;  %v490_v43 = vld [vmem:[%s893_s1 + $0xc8] sm:$0xf0]  ;;  %v489_v45 = vor.u32 %v543_v39, %v488_v37  ;;  %v429_v46 = vor.u32 %v526_v40, %v426_v41  ;;  %v416_v47 = vld [vmem:[%s893_s1 + $0x30] sm:$0xf] }
   0xc   :  { %230 = vmatpush.bf16.msra.mxu0 %v433_v29  ;;  %v525_v48 = vld [vmem:[%s893_s1 + $0x34] sm:$0xf0]  ;;  %v480_v49 = vld [vmem:[%s893_s1 + $0xb0] sm:$0xf]  ;;  %v493_v50 = vor.u32 %v542_v42, %v490_v43  ;;  %v524_v52 = vld [vmem:[%s893_s1 + $0x34] sm:$0xf] }
   0xd   :  { %243 = vmatpush.bf16.msra.mxu1 %v497_v33  ;;  %256 = vmatpush.bf16.msra.mxu2 %v437_v34  ;;  %v541_v51 = vld [vmem:[%s893_s1 + $0xb4] sm:$0xf0]  ;;  %v418_v53 = vld [vmem:[%s893_s1 + $0x38] sm:$0xf0]  ;;  %v540_v54 = vld [vmem:[%s893_s1 + $0xb4] sm:$0xf]  ;;  %v417_v56 = vor.u32 %v525_v48, %v416_v47 }
   0xe   :  { %269 = vmatpush.bf16.msra.mxu3 %v501_v38  ;;  %v482_v55 = vld [vmem:[%s893_s1 + $0xb8] sm:$0xf0]  ;;  %v481_v57 = vor.u32 %v541_v51, %v480_v49  ;;  %v421_v58 = vor.u32 %v524_v52, %v418_v53  ;;  %v408_v59 = vld [vmem:[%s893_s1 + $0x20] sm:$0xf]  ;;  %v523_v60 = vld [vmem:[%s893_s1 + $0x24] sm:$0xf0] }
   0xf   :  { %v472_v61 = vld [vmem:[%s893_s1 + $0xa0] sm:$0xf]  ;;  %v485_v62 = vor.u32 %v540_v54, %v482_v55  ;;  %v539_v63 = vld [vmem:[%s893_s1 + $0xa4] sm:$0xf0]  ;;  %v522_v0 = vld [vmem:[%s893_s1 + $0x24] sm:$0xf]  ;;  %v409_v4 = vor.u32 %v523_v60, %v408_v59 }
  0x10   :  { %231 = vmatpush.bf16.msra.mxu0 %v425_v44  ;;  %v410_v1 = vld [vmem:[%s893_s1 + $0x28] sm:$0xf0]  ;;  %v538_v2 = vld [vmem:[%s893_s1 + $0xa4] sm:$0xf]  ;;  %v473_v5 = vor.u32 %v539_v63, %v472_v61  ;;  %v400_v7 = vld [vmem:[%s893_s1 + $0x10] sm:$0xf] }
  0x11   :  { %244 = vmatpush.bf16.msra.mxu1 %v489_v45  ;;  %257 = vmatpush.bf16.msra.mxu2 %v429_v46  ;;  %v474_v3 = vld [vmem:[%s893_s1 + $0xa8] sm:$0xf0]  ;;  %v413_v6 = vor.u32 %v522_v0, %v410_v1  ;;  %v521_v8 = vld [vmem:[%s893_s1 + $0x14] sm:$0xf0]  ;;  %v464_v9 = vld [vmem:[%s893_s1 + $0x90] sm:$0xf] }
  0x12   :  { %270 = vmatpush.bf16.msra.mxu3 %v493_v50  ;;  %v477_v10 = vor.u32 %v538_v2, %v474_v3  ;;  %v537_v11 = vld [vmem:[%s893_s1 + $0x94] sm:$0xf0]  ;;  %v520_v12 = vld [vmem:[%s893_s1 + $0x14] sm:$0xf]  ;;  %v402_v13 = vld [vmem:[%s893_s1 + $0x18] sm:$0xf0]  ;;  %v401_v16 = vor.u32 %v521_v8, %v400_v7 }
  0x13   :  { %v536_v14 = vld [vmem:[%s893_s1 + $0x94] sm:$0xf]  ;;  %v466_v15 = vld [vmem:[%s893_s1 + $0x98] sm:$0xf0]  ;;  %v22_v17 = vld [vmem:[%s894_s0] sm:$0xff]  ;;  %v465_v18 = vor.u32 %v537_v11, %v464_v9  ;;  %v405_v19 = vor.u32 %v520_v12, %v402_v13 }
  0x14   :  { %232 = vmatpush.bf16.msra.mxu0 %v417_v56  ;;  %v392_v20 = vld [vmem:[%s893_s1] sm:$0xf]  ;;  %v519_v21 = vld [vmem:[%s893_s1 + $0x4] sm:$0xf0]  ;;  %v469_v23 = vor.u32 %v536_v14, %v466_v15  ;;  %v518_v25 = vld [vmem:[%s893_s1 + $0x4] sm:$0xf]  ;;  %v62_v29 = vunpack.c.l.b16 %v22_v17  ;;  %v63_v31 = vunpack.c.h.b16 %v22_v17 }
  0x15   :  { %245 = vmatpush.bf16.msra.mxu1 %v481_v57  ;;  %258 = vmatpush.bf16.msra.mxu2 %v421_v58  ;;  %v456_v22 = vld [vmem:[%s893_s1 + $0x80] sm:$0xf]  ;;  %v535_v24 = vld [vmem:[%s893_s1 + $0x84] sm:$0xf0]  ;;  %v394_v26 = vld [vmem:[%s893_s1 + $0x8] sm:$0xf0]  ;;  %v393_v30 = vor.u32 %v519_v21, %v392_v20 }
  0x16   :  { %271 = vmatpush.bf16.msra.mxu3 %v485_v62  ;;  %v534_v27 = vld [vmem:[%s893_s1 + $0x84] sm:$0xf]  ;;  %v458_v28 = vld [vmem:[%s893_s1 + $0x88] sm:$0xf0]  ;;  %v457_v32 = vor.u32 %v535_v24, %v456_v22  ;;  %v397_v33 = vor.u32 %v518_v25, %v394_v26  ;;  %v64_v35 = vpack.c.b16 %v62_v29, %v62_v29  ;;  %v297_v36 = vld [vmem:[%s895_s3 + $0x78] sm:$0xff]  ;;  %v65_v37 = vpack.c.b16 %v63_v31, %v63_v31 }
  0x17   :  { %v461_v34 = vor.u32 %v534_v27, %v458_v28  ;;  %v313_v38 = vld [vmem:[%s895_s3 + $0xf8] sm:$0xff]  ;;  %v296_v39 = vld [vmem:[%s895_s3 + $0x70] sm:$0xff]  ;;  %v295_v41 = vld [vmem:[%s895_s3 + $0x68] sm:$0xff] }
  0x18   :  { %233 = vmatpush.bf16.msra.mxu0 %v409_v4  ;;  %v312_v40 = vld [vmem:[%s895_s3 + $0xf0] sm:$0xff]  ;;  %v311_v42 = vld [vmem:[%s895_s3 + $0xe8] sm:$0xff]  ;;  %v294_v43 = vld [vmem:[%s895_s3 + $0x60] sm:$0xff] }
  0x19   :  { %246 = vmatpush.bf16.msra.mxu1 %v473_v5  ;;  %259 = vmatpush.bf16.msra.mxu2 %v413_v6  ;;  %v310_v44 = vld [vmem:[%s895_s3 + $0xe0] sm:$0xff]  ;;  %v293_v45 = vld [vmem:[%s895_s3 + $0x58] sm:$0xff]  ;;  %v292_v47 = vld [vmem:[%s895_s3 + $0x50] sm:$0xff] }
  0x1a   :  { %272 = vmatpush.bf16.msra.mxu3 %v477_v10  ;;  %v309_v46 = vld [vmem:[%s895_s3 + $0xd8] sm:$0xff]  ;;  %v308_v48 = vld [vmem:[%s895_s3 + $0xd0] sm:$0xff]  ;;  %v291_v49 = vld [vmem:[%s895_s3 + $0x48] sm:$0xff] }
  0x1b   :  { %v307_v50 = vld [vmem:[%s895_s3 + $0xc8] sm:$0xff]  ;;  %v290_v51 = vld [vmem:[%s895_s3 + $0x40] sm:$0xff]  ;;  %v289_v53 = vld [vmem:[%s895_s3 + $0x38] sm:$0xff] }
  0x1c   :  { %234 = vmatpush.bf16.msra.mxu0 %v401_v16  ;;  %v306_v52 = vld [vmem:[%s895_s3 + $0xc0] sm:$0xff]  ;;  %v305_v54 = vld [vmem:[%s895_s3 + $0xb8] sm:$0xff]  ;;  %v288_v55 = vld [vmem:[%s895_s3 + $0x30] sm:$0xff] }
  0x1d   :  { %247 = vmatpush.bf16.msra.mxu1 %v465_v18  ;;  %260 = vmatpush.bf16.msra.mxu2 %v405_v19  ;;  %v287_v56 = vld [vmem:[%s895_s3 + $0x28] sm:$0xff]  ;;  %v304_v57 = vld [vmem:[%s895_s3 + $0xb0] sm:$0xff]  ;;  %v286_v58 = vld [vmem:[%s895_s3 + $0x20] sm:$0xff] }
  0x1e   :  { %273 = vmatpush.bf16.msra.mxu3 %v469_v23  ;;  %v303_v59 = vld [vmem:[%s895_s3 + $0xa8] sm:$0xff]  ;;  %v285_v60 = vld [vmem:[%s895_s3 + $0x18] sm:$0xff]  ;;  %v302_v61 = vld [vmem:[%s895_s3 + $0xa0] sm:$0xff] }
  0x1f   :  { %v284_v62 = vld [vmem:[%s895_s3 + $0x10] sm:$0xff]  ;;  %v301_v63 = vld [vmem:[%s895_s3 + $0x98] sm:$0xff]  ;;  %v283_v0 = vld [vmem:[%s895_s3 + $0x8] sm:$0xff] }
  0x20   :  { %235 = vmatpush.bf16.msra.mxu0 %v393_v30  ;;  %v300_v1 = vld [vmem:[%s895_s3 + $0x90] sm:$0xff]  ;;  %v282_v2 = vld [vmem:[%s895_s3] sm:$0xff]  ;;  %v299_v3 = vld [vmem:[%s895_s3 + $0x88] sm:$0xff] }
  0x21   :  { %248 = vmatpush.bf16.msra.mxu1 %v457_v32  ;;  %261 = vmatpush.bf16.msra.mxu2 %v397_v33  ;;  %v298_v4 = vld [vmem:[%s895_s3 + $0x80] sm:$0xff] }
  0x22   :  { %274 = vmatpush.bf16.msra.mxu3 %v461_v34  ;;  %v55_v5 = vld [vmem:[%s897_s2] sm:$0x3] }
  0x23   :  { %236 = vmatmul.bf16.vlgmr.msra.gmra.mxu0 %v64_v35  ;;  %v57_v6 = vperm.slane %v55_v5, 0  ;;  %v58_v11 = vperm.slane %v55_v5, 1  ;;  %v550_v22 = vld [vmem:[%s896_s4] ss:$0 sm:$0xff] }
  0x24   :  { %318 = vmatpush.msrb.mxu0 %v297_v36  ;;  %249 = vmatmul.bf16.vlgmr.msra.gmra.mxu1 %v65_v37 }
  0x25   :  { %338 = vmatpush.msrb.mxu1 %v313_v38  ;;  %262 = vmatmul.bf16.vlgmr.msra.gmra.mxu2 %v64_v35 }
  0x26   :  { %275 = vmatmul.bf16.vlgmr.msra.gmra.mxu3 %v65_v37  ;;  %319 = vmatpush.msrb.mxu0 %v296_v39 }
  0x27   :  { %339 = vmatpush.msrb.mxu1 %v312_v40 }
  0x28   :  { %320 = vmatpush.msrb.mxu0 %v295_v41 }
  0x29   :  { %340 = vmatpush.msrb.mxu1 %v311_v42 }
  0x2a   :  { %321 = vmatpush.msrb.mxu0 %v294_v43 }
  0x2b   :  { %341 = vmatpush.msrb.mxu1 %v310_v44 }
  0x2c   :  { %322 = vmatpush.msrb.mxu0 %v293_v45 }
  0x2d   :  { %342 = vmatpush.msrb.mxu1 %v309_v46 }
  0x2e   :  { %323 = vmatpush.msrb.mxu0 %v292_v47 }
  0x2f   :  { %343 = vmatpush.msrb.mxu1 %v308_v48 }
  0x30   :  { %324 = vmatpush.msrb.mxu0 %v291_v49 }
  0x31   :  { %344 = vmatpush.msrb.mxu1 %v307_v50 }
  0x32   :  { %325 = vmatpush.msrb.mxu0 %v290_v51 }
  0x33   :  { %345 = vmatpush.msrb.mxu1 %v306_v52 }
  0x34   :  { %326 = vmatpush.msrb.mxu0 %v289_v53 }
  0x35   :  { %346 = vmatpush.msrb.mxu1 %v305_v54 }
  0x36   :  { %327 = vmatpush.msrb.mxu0 %v288_v55 }
  0x37   :  { %347 = vmatpush.msrb.mxu1 %v304_v57 }
  0x38   :  { %328 = vmatpush.msrb.mxu0 %v287_v56 }
  0x39   :  { %348 = vmatpush.msrb.mxu1 %v303_v59 }
  0x3a   :  { %329 = vmatpush.msrb.mxu0 %v286_v58 }
  0x3b   :  { %349 = vmatpush.msrb.mxu1 %v302_v61 }
  0x3c   :  { %330 = vmatpush.msrb.mxu0 %v285_v60 }
  0x3d   :  { %350 = vmatpush.msrb.mxu1 %v301_v63 }
  0x3e   :  { %331 = vmatpush.msrb.mxu0 %v284_v62 }
  0x3f   :  { %351 = vmatpush.msrb.mxu1 %v300_v1 }
  0x40   :  { %332 = vmatpush.msrb.mxu0 %v283_v0 }
  0x41   :  { %352 = vmatpush.msrb.mxu1 %v299_v3 }
  0x42   :  { %333 = vmatpush.msrb.mxu0 %v282_v2 }
  0x43   :  { %353 = vmatpush.msrb.mxu1 %v298_v4 }
  0xa0   :  { %v237_v7 = vpop.f32.mrf.mxu0 }
  0xa1   :  { %v238_v8 = vadd.f32 %v237_v7, %v57_v6  ;;  %v250_v9 = vpop.f32.mrf.mxu1 }
  0xa3   :  { %v251_v10 = vadd.f32 %v250_v9, %v238_v8 }
  0xa5   :  { %v280_v12 = vmax.f32 %v251_v10, 0.0 }
  0xa7   :  { %334 = vmatmul.f32.vlgmr.msrb.gmra.mxu0 %v280_v12 }
  0xa8   :  { %v263_v13 = vpop.f32.mrf.mxu2  ;;  %v239_v16 = vpop.f32.mrf.mxu0 }
  0xa9   :  { %v264_v14 = vadd.f32 %v263_v13, %v58_v11  ;;  %v276_v15 = vpop.f32.mrf.mxu3  ;;  %v252_v17 = vpop.f32.mrf.mxu1 }
  0xab   :  { %v277_v18 = vadd.f32 %v276_v15, %v264_v14 }
  0xad   :  { %v281_v19 = vmax.f32 %v277_v18, 0.0 }
  0xaf   :  { %354 = vmatmul.f32.vlgmr.msrb.gmra.mxu1 %v281_v19 }
  0xb0   :  { %v265_v20 = vpop.f32.mrf.mxu2 }
  0xb1   :  { %v278_v21 = vpop.f32.mrf.mxu3 }
 0x124   :  { %v335_v23 = vpop.f32.mrf.mxu0 }
 0x125   :  { %v336_v24 = vadd.f32 %v550_v22, %v335_v23 }
 0x12c   :  { %v355_v25 = vpop.f32.mrf.mxu1 }
 0x12d   :  { %v356_v26 = vadd.f32 %v355_v25, %v336_v24 }
 0x12f   :  { %358 = vst [vmem:[%s898_s5] sm:$0xff] %v356_v26  ;;  %359 = vmax.xlane.f32.xlu0 %v356_v26 }
 0x1a2   :  { %v360_v27 = vpop.xlane.xlu0 %359 }
 0x1a3   :  { %v361_v28 = vsub.f32 %v356_v26, %v360_v27 }
 0x1a5   :  { %v362_v29 = vmul.f32 1.442695, %v361_v28 }
 0x1a7   :  { %551 = vpow2.f32 %v362_v29 }
 0x1ad   :  { %v552_v30 = vpop.eup %551 }
 0x1ae   :  { %364 = vadd.xlane.f32.xlu0 %v552_v30 }
 0x221   :  { %v365_v31 = vpop.xlane.xlu0 %364 }
 0x222   :  { %553 = vrcp.f32 %v365_v31  ;;  %v377_v35 = vand.u32 2147483648, %v365_v31  ;;  %v375_v37 = vand.u32 2147483647, %v365_v31  ;;  %vm371_vm1 = vweird.f32 %v365_v31 }
 0x224   :  { %v378_v39 = vor.u32 1.1754944e-38, %v377_v35  ;;  %vm376_vm3 = vcmp.eq.f32.partialorder %v375_v37, 8.507059e+37 }
 0x228   :  { %v554_v32 = vpop.eup %553 }
 0x229   :  { %v367_v33 = vmul.f32 %v554_v32, %v365_v31  ;;  %vm372_vm0 = vweird.f32 %v554_v32 }
 0x22a   :  { %vm373_vm2 = vmor %vm371_vm1, %vm372_vm0 }
 0x22b   :  { %v368_v34 = vsub.f32 1.0, %v367_v33 }
 0x22d   :  { %v369_v36 = vmul.f32 %v554_v32, %v368_v34 }
 0x22f   :  { %v370_v38 = vadd.f32 %v554_v32, %v369_v36 }
 0x231   :  { %v374_v40 = vsel %vm373_vm2, %v554_v32, %v370_v38 }
 0x232   :  { %v379_v41 = vsel %vm376_vm3, %v378_v39, %v374_v40 }
 0x233   :  { %v380_v42 = vmul.f32 %v552_v30, %v379_v41 }
 0x235   :  { %381 = vst [vmem:[%s899_s6] sm:$0xff] %v380_v42 }

</bundles_post_ra>
